<compile_context>
chip_gen: v5e
topology: v5e:2x2
jax: 0.10.0
libtpu: 0.0.40
codegen_flags: <defaults>
</compile_context>

<pallas_src>
import jax
import jax.numpy as jnp
from jax import lax
from jax.experimental import pallas as pl
from jax.experimental.pallas import tpu as pltpu

IMAGENET_MEAN = (0.485, 0.456, 0.406)
IMAGENET_STD = (0.229, 0.224, 0.225)
MARGIN = 0.3
SIZE = (384, 128)          # (H_out, W_out), as in the module
POOL = (48, 16)            # synthetic backbone patch-average pooling
NUM_FEATURES = 256
LANE = 128


def _round_up(x, m):
    return ((x + m - 1) // m) * m


# ---------------------------------------------------------------------------
# Wrapper-side construction of the fused (weight-only) preprocess operator.
# Data-independent weight folding (like folding BN into a conv); done ONCE.
# ---------------------------------------------------------------------------
def _bilinear_matrix(out_size, in_size):
    # align_corners=False semantics; rows sum to 1, so upsample(const) == const.
    scale = in_size / out_size
    dst = jnp.arange(out_size, dtype=jnp.float32)
    src = jnp.maximum((dst + 0.5) * scale - 0.5, 0.0)
    i0 = jnp.clip(jnp.floor(src).astype(jnp.int32), 0, in_size - 1)
    i1 = jnp.minimum(i0 + 1, in_size - 1)
    w1 = src - i0.astype(jnp.float32)
    w0 = 1.0 - w1
    rows = jnp.arange(out_size)
    m = jnp.zeros((out_size, in_size), jnp.float32)
    m = m.at[rows, i0].add(w0)
    m = m.at[rows, i1].add(w1)
    return m


def _avgpool_matrix(out_size, in_size):
    # Non-overlapping block average: P[i, i*k:(i+1)*k] = 1/k; rows sum to 1.
    k = in_size // out_size
    return jnp.repeat(jnp.eye(out_size, dtype=jnp.float32), k, axis=1) / k


def build_fused_preprocess_operator(Hin, Win):
    """Return (K, shift) such that, for a BGR image x in [-1,1] flattened
    channel-major to (1, 3*Hin*Win):
        x_flat @ K + shift == flatten( patch_avg_pool( imagenet_norm(
                                  bilinear_upsample( bgr2rgb(x/2 + 0.5), SIZE)), POOL) )
    Exactness: upsample / pooling are linear with rows summing to 1, so the
    /2+0.5 and mean/std affines commute through them.
    """
    Hout, Wout = SIZE
    ph, pw = POOL
    Hp, Wp = Hout // ph, Wout // pw                       # 8, 8
    A = _bilinear_matrix(Hout, Hin)                       # (384, Hin)
    Bm = _bilinear_matrix(Wout, Win)                      # (128, Win)
    A_pool = _avgpool_matrix(Hp, Hout) @ A                # (Hp, Hin)
    B_pool = _avgpool_matrix(Wp, Wout) @ Bm               # (Wp, Win)

    # vec_row(A_pool @ X @ B_pool^T) == vec_row(X) @ kron(A_pool, B_pool)^T
    Kc = jnp.kron(A_pool, B_pool)                         # (Hp*Wp, Hin*Win)

    scales = jnp.array([0.5 / s for s in IMAGENET_STD], jnp.float32)
    shifts = jnp.array([(0.5 - m) / s for m, s in zip(IMAGENET_MEAN, IMAGENET_STD)],
                       jnp.float32)

    CHW = 3 * Hin * Win
    DIN = 3 * Hp * Wp
    K = jnp.zeros((CHW, DIN), jnp.float32)
    for c in range(3):            # output RGB channel
        b = 2 - c                 # input BGR channel (permute = [2, 1, 0] folded here)
        K = K.at[b * Hin * Win:(b + 1) * Hin * Win,
                 c * Hp * Wp:(c + 1) * Hp * Wp].set(scales[c] * Kc.T)
    shift = jnp.repeat(shifts, Hp * Wp)[None, :]          # (1, DIN)
    return K, shift


def prepare_reid_weights(K, shift, w_feat, k_tile_target=1024):
    """One-time weight prep (outside jit):
      * fold the affine shift into a post-embedding bias:  bias = shift @ w_feat
      * zero-pad DIN 192 -> 256 (lane-dense vregs, full MXU tiles; zero FLOPs)
      * pad CHW (K rows) to a multiple of the K-contraction tile
      * cast the matmul weights to bf16 (f32 accumulation happens in-kernel)
    Returns (K_bf16, w_bf16, bias_f32, k_tile)."""
    chw, din = K.shape
    d = w_feat.shape[1]
    bias = (shift @ w_feat).astype(jnp.float32)           # (1, D), exact affine fold

    din_pad = _round_up(din, LANE)
    chw128 = _round_up(chw, LANE)
    k_tile = min(k_tile_target, chw128)
    chw_pad = _round_up(chw, k_tile)

    K_p = jnp.pad(K, ((0, chw_pad - chw), (0, din_pad - din)))
    w_p = jnp.pad(w_feat, ((0, din_pad - din), (0, 0)))
    return K_p.astype(jnp.bfloat16), w_p.astype(jnp.bfloat16), bias, k_tile


# ---------------------------------------------------------------------------
# Kernel 1: fused preprocess + pooled-backbone + embedding + L2 normalization
#           (K streamed over a contraction grid axis, bf16 MXU, f32 accumulate)
# ---------------------------------------------------------------------------
def _feature_kernel(x_ref, k_ref, w_ref, b_ref, o_ref, acc_ref):
    # x_ref:   (TB, tk)      bf16 raw flattened BGR image slab (k-th chunk)
    # k_ref:   (tk, DINp)    bf16 fused preprocess operator (k-th row block)
    # w_ref:   (DINp, D)     bf16 synthetic embedding weights (constant block)
    # b_ref:   (1, D)        f32  folded bias = shift @ w_feat (constant block)
    # o_ref:   (TB, D)       f32  L2-normalized features
    # acc_ref: (TB, DINp)    f32  pooled-feature accumulator (VMEM scratch)
    k_step = pl.program_id(1)

    @pl.when(k_step == 0)
    def _():
        acc_ref[...] = jnp.zeros_like(acc_ref)

    acc_ref[...] += jnp.dot(x_ref[...], k_ref[...],
                            preferred_element_type=jnp.float32)

    @pl.when(k_step == pl.num_programs(1) - 1)
    def _():
        # Embedding matmul on the finished pooled features, then f32 epilogue.
        f = jnp.dot(acc_ref[...].astype(jnp.bfloat16), w_ref[...],
                    preferred_element_type=jnp.float32) + b_ref[...]       # (TB, D)
        # f / ||f||_2 via a single EUP rsqrt; +1e-12 guards a zero row (the torch
        # reference would NaN there; epsilon changes nonzero rows ~1e-12 relative).
        sumsq = jnp.sum(f * f, axis=1, keepdims=True)                      # (TB, 1)
        o_ref[...] = f * lax.rsqrt(sumsq + 1e-12)


def extract_features_pallas(x_flat, K_bf16, w_bf16, bias, k_tile,
                            row_tile_target=256):
    n, chw = x_flat.shape
    chw_pad, din_pad = K_bf16.shape
    d = w_bf16.shape[1]

    # Row tile: whole batch when small, else MXU-sized; multiple of 16 (bf16 rows).
    row_tile = min(row_tile_target, _round_up(n, 16))
    n_pad = _round_up(n, row_tile)

    x = jnp.pad(x_flat.astype(jnp.bfloat16),
                ((0, n_pad - n), (0, chw_pad - chw)))
    n_k = chw_pad // k_tile

    # Explicit scoped-VMEM budget (default is only 16/32 MiB): double-buffered
    # tiles + constant weights + accumulator, with headroom.
    need = (2 * row_tile * k_tile * 2          # x tiles (bf16, 2 buffers)
            + 2 * k_tile * din_pad * 2         # K tiles
            + 2 * din_pad * d * 2              # w_feat
            + 2 * d * 4                        # bias
            + 2 * row_tile * d * 4             # output tiles
            + row_tile * din_pad * 4)          # f32 accumulator scratch
    vmem_limit = min(64 * 1024 * 1024, max(32 * 1024 * 1024, int(need * 1.5)))

    out = pl.pallas_call(
        _feature_kernel,
        out_shape=jax.ShapeDtypeStruct((n_pad, d), jnp.float32),
        grid=(n_pad // row_tile, n_k),
        in_specs=[
            pl.BlockSpec((row_tile, k_tile), lambda i, k: (i, k)),
            pl.BlockSpec((k_tile, din_pad), lambda i, k: (k, 0)),
            pl.BlockSpec((din_pad, d), lambda i, k: (0, 0)),     # constant block
            pl.BlockSpec((1, d), lambda i, k: (0, 0)),           # constant block
        ],
        out_specs=pl.BlockSpec((row_tile, d), lambda i, k: (i, 0)),
        scratch_shapes=[pltpu.VMEM((row_tile, din_pad), jnp.float32)],
        compiler_params=pltpu.CompilerParams(
            dimension_semantics=("parallel", "arbitrary"),
            vmem_limit_bytes=vmem_limit),
    )(x, K_bf16, w_bf16, bias)
    return out[:n]


# ---------------------------------------------------------------------------
# Kernel 2: euclidean_dist + hard_example_mining + MarginRankingLoss (fused),
#           tiled over anchor rows, lane-dense per-anchor loss output.
# ---------------------------------------------------------------------------
def _triplet_hard_kernel(xa_ref, yg_ref, ta_ref, tg_ref, o_ref):
    x = xa_ref[...]                       # (tq, D)  anchor (data) features, unit norm
    y = yg_ref[...]                       # (Ng, D)  gallery (label) features, unit norm
    t_a = ta_ref[...]                     # (1, tq)  anchor targets (-1 => padding)
    t_g = tg_ref[...]                     # (1, Ng)  gallery targets (-1 => padding)

    # Both feature sets are unit L2-normalized (extract_features divides by the
    # row norm), so ||x||^2 = ||y||^2 = 1 and
    #   d2 = ||x-y||^2 = 2 - 2 x.y   (exact up to fp rounding).
    # NOTE: if the normalization is ever removed, restore the xx + yy - 2g form.
    g = lax.dot_general(x, y, (((1,), (1,)), ((), ())),
                        preferred_element_type=jnp.float32)                # (tq, Ng)
    d2 = jnp.maximum(2.0 - 2.0 * g, 1e-12)        # clamp(min=1e-12), squared dist

    t_a_col = jnp.transpose(t_a)                                          # (tq, 1)
    valid_a = t_a_col >= 0                                                # (tq, 1)
    valid_g = t_g >= 0                                                    # (1, Ng)
    is_pos = (t_a_col == t_g) & valid_g                                   # (tq, Ng)

    # Hard mining on SQUARED distances (sqrt is monotonic -> same arg-extrema);
    # sqrt only on the mined values. Padded gallery columns are excluded from
    # both the positive max and the negative min.
    d2_ap = jnp.max(jnp.where(is_pos, d2, 0.0), axis=1, keepdims=True)    # (tq, 1)
    d2_an = jnp.min(jnp.where(is_pos | (~valid_g), jnp.float32(1e30), d2),
                    axis=1, keepdims=True)                                # (tq, 1)
    dist_ap = jnp.sqrt(d2_ap)
    dist_an = jnp.sqrt(d2_an)   # rows with no valid negatives keep a huge sentinel
                                # -> their hinge clamps to 0 (as in the reference)

    # MarginRankingLoss(dist_an, dist_ap, y=1): mean(max(0, dist_ap - dist_an + m)).
    # Padded anchor rows are masked out here; the wrapper divides by the true N.
    losses = jnp.where(valid_a,
                       jnp.maximum(dist_ap - dist_an + MARGIN, 0.0), 0.0)  # (tq, 1)
    # Lane-dense (unmasked) store: broadcast across the 128 lanes.
    o_ref[...] = jnp.broadcast_to(losses, o_ref.shape)


def triplet_hard_loss_pallas(feat_data, feat_label, targets):
    n, d = feat_data.shape
    # Anchor-row tiling: whole (8-padded) batch when small; 256-row tiles when
    # large (parallel grid -> both v7x TensorCores; bounds (N,N) VMEM elsewhere).
    if n <= 256:
        n_pad = _round_up(n, 8)
        tq = n_pad
    else:
        tq = 256
        n_pad = _round_up(n, tq)
    pad = n_pad - n

    fd = jnp.pad(feat_data, ((0, pad), (0, 0)))
    fl = jnp.pad(feat_label, ((0, pad), (0, 0)))
    t_row = jnp.pad(targets.astype(jnp.int32).reshape(1, n),
                    ((0, 0), (0, pad)), constant_values=-1)               # (1, n_pad)

    out = pl.pallas_call(
        _triplet_hard_kernel,
        out_shape=jax.ShapeDtypeStruct((n_pad, 128), jnp.float32),
        grid=(n_pad // tq,),
        in_specs=[
            pl.BlockSpec((tq, d), lambda i: (i, 0)),        # anchor feature tile
            pl.BlockSpec((n_pad, d), lambda i: (0, 0)),     # full gallery features
            pl.BlockSpec((1, tq), lambda i: (0, i)),        # anchor targets (row)
            pl.BlockSpec((1, n_pad), lambda i: (0, 0)),     # gallery targets (row)
        ],
        out_specs=pl.BlockSpec((tq, 128), lambda i: (i, 0)),
        compiler_params=pltpu.CompilerParams(dimension_semantics=("parallel",)),
    )(fd, fl, t_row, t_row)

    return jnp.sum(out[:, 0]) / n


# ---------------------------------------------------------------------------
# Full forward (mirrors ReIDLoss.forward return signature)
# ---------------------------------------------------------------------------
def reid_loss_forward(data, label, targets, K_bf16, w_bf16, bias, k_tile):
    B = data.shape[0]
    # One preprocess+feature pass for data AND label (concatenated along batch);
    # the (2B,3,Hin,Win) -> (2B, CHW) reshape of contiguous NCHW is free.
    imgs = jnp.concatenate([data, label], axis=0)
    x_flat = imgs.reshape(2 * B, -1)
    feats = extract_features_pallas(x_flat, K_bf16, w_bf16, bias, k_tile)
    feat_d = feats[:B]
    feat_l = lax.stop_gradient(feats[B:])    # .detach_()
    loss = triplet_hard_loss_pallas(feat_d, feat_l, targets)
    z = jnp.zeros((1,), jnp.float32)
    return (z, z, loss, z, z, z)


if __name__ == "__main__":
    key = jax.random.PRNGKey(0)
    k_data, k_label, k_w = jax.random.split(key, 3)

    # Small inputs consistent with the module: NCHW, 3-channel BGR images in [-1, 1].
    B, C, Hin, Win = 4, 3, 16, 16
    data = jax.random.uniform(k_data, (B, C, Hin, Win), jnp.float32, -1.0, 1.0)
    label = jax.random.uniform(k_label, (B, C, Hin, Win), jnp.float32, -1.0, 1.0)
    targets = jnp.array([0, 0, 1, 1], dtype=jnp.int32)   # 2 ids x 2 samples

    # Deterministic synthetic embedding weights (stand-in for the backbone head).
    Hp, Wp = SIZE[0] // POOL[0], SIZE[1] // POOL[1]      # 8, 8
    din = C * Hp * Wp                                    # 192
    w_feat = 0.05 * jax.random.normal(k_w, (din, NUM_FEATURES), jnp.float32)

    # One-time weight folding / padding / bf16 cast.
    K, shift = build_fused_preprocess_operator(Hin, Win)
    # k_tile_target=256 so the toy CHW=768 exercises the streamed K-contraction
    # path (3 accumulation steps); production default is 1024.
    K_bf16, w_bf16, bias, k_tile = prepare_reid_weights(K, shift, w_feat,
                                                        k_tile_target=256)

    fwd = jax.jit(reid_loss_forward, static_argnames=("k_tile",))
    outs = fwd(data, label, targets, K_bf16, w_bf16, bias, k_tile=k_tile)
    jax.block_until_ready(outs)
    print("KERNEL_OK")
</pallas_src>

<mosaic_0001>
module attributes {stable_mosaic.version = 11 : i64} {
  func.func @_feature_kernel(%arg0: i32, %arg1: i32, %arg2: memref<16x256xbf16, #tpu.memory_space<vmem>>, %arg3: memref<256x256xbf16, #tpu.memory_space<vmem>>, %arg4: memref<256x256xbf16, #tpu.memory_space<vmem>>, %arg5: memref<1x256xf32, #tpu.memory_space<vmem>>, %arg6: memref<16x256xf32, #tpu.memory_space<vmem>>, %arg7: memref<16x256xf32, #tpu.memory_space<vmem>>) attributes {dimension_semantics = [#tpu.dimension_semantics<parallel>, #tpu.dimension_semantics<arbitrary>], iteration_bounds = array<i64: 1, 3>, scalar_prefetch = 0 : i64, scratch_operands = 1 : i64, tpu.core_type = #tpu.core_type<tc>, window_params = [{transform_indices = @transform_0, window_bounds = array<i64: 16, 256>}, {transform_indices = @transform_1, window_bounds = array<i64: 256, 256>}, {pipeline_mode = #tpu.pipeline_mode<synchronous>, transform_indices = @transform_2, window_bounds = array<i64: 256, 256>}, {pipeline_mode = #tpu.pipeline_mode<synchronous>, transform_indices = @transform_3, window_bounds = array<i64: 1, 256>}, {transform_indices = @transform_4, window_bounds = array<i64: 16, 256>}]} {
    %c0_i32 = arith.constant 0 : i32
    %0 = arith.cmpi eq, %arg1, %c0_i32 : i32
    %1 = arith.extui %0 : i1 to i32
    %c0_i32_0 = arith.constant 0 : i32
    %2 = arith.cmpi ne, %1, %c0_i32_0 : i32
    scf.if %2 {
      %cst_9 = arith.constant 0.000000e+00 : f32
      %12 = vector.broadcast %cst_9 : f32 to vector<16x256xf32>
      %c0_10 = arith.constant 0 : index
      %c0_11 = arith.constant 0 : index
      %13 = vector.load %arg7[%c0_10, %c0_11] : memref<16x256xf32, #tpu.memory_space<vmem>>, vector<16x256xf32>
      tpu.vector_store %arg7[%c0_10, %c0_11], %12 {strides = array<i32>} : memref<16x256xf32, #tpu.memory_space<vmem>>, vector<16x256xf32>,
    } else {
    }
    %c0 = arith.constant 0 : index
    %c0_1 = arith.constant 0 : index
    %3 = vector.load %arg7[%c0, %c0_1] : memref<16x256xf32, #tpu.memory_space<vmem>>, vector<16x256xf32>
    %c0_2 = arith.constant 0 : index
    %c0_3 = arith.constant 0 : index
    %4 = vector.load %arg2[%c0_2, %c0_3] : memref<16x256xbf16, #tpu.memory_space<vmem>>, vector<16x256xbf16>
    %c0_4 = arith.constant 0 : index
    %c0_5 = arith.constant 0 : index
    %5 = vector.load %arg3[%c0_4, %c0_5] : memref<256x256xbf16, #tpu.memory_space<vmem>>, vector<256x256xbf16>
    %cst = arith.constant dense<0.000000e+00> : vector<16x256xf32>
    %6 = tpu.matmul %4, %5, %cst {dimension_numbers = #tpu.dot_dimension_numbers<[1], [0], [0], [1], [0, 0, 1, 1], [], []>} : vector<16x256xbf16>, vector<256x256xbf16>, vector<16x256xf32> -> vector<16x256xf32>
    %7 = arith.addf %3, %6 : vector<16x256xf32>
    %c0_6 = arith.constant 0 : index
    %c0_7 = arith.constant 0 : index
    %8 = vector.load %arg7[%c0_6, %c0_7] : memref<16x256xf32, #tpu.memory_space<vmem>>, vector<16x256xf32>
    tpu.vector_store %arg7[%c0_6, %c0_7], %7 {strides = array<i32>} : memref<16x256xf32, #tpu.memory_space<vmem>>, vector<16x256xf32>,
    %c2_i32 = arith.constant 2 : i32
    %9 = arith.cmpi eq, %arg1, %c2_i32 : i32
    %10 = arith.extui %9 : i1 to i32
    %c0_i32_8 = arith.constant 0 : i32
    %11 = arith.cmpi ne, %10, %c0_i32_8 : i32
    scf.if %11 {
      %c0_9 = arith.constant 0 : index
      %c0_10 = arith.constant 0 : index
      %12 = vector.load %arg7[%c0_9, %c0_10] : memref<16x256xf32, #tpu.memory_space<vmem>>, vector<16x256xf32>
      %13 = arith.truncf %12 : vector<16x256xf32> to vector<16x256xbf16>
      %c0_11 = arith.constant 0 : index
      %c0_12 = arith.constant 0 : index
      %14 = vector.load %arg4[%c0_11, %c0_12] : memref<256x256xbf16, #tpu.memory_space<vmem>>, vector<256x256xbf16>
      %cst_13 = arith.constant dense<0.000000e+00> : vector<16x256xf32>
      %15 = tpu.matmul %13, %14, %cst_13 {dimension_numbers = #tpu.dot_dimension_numbers<[1], [0], [0], [1], [0, 0, 1, 1], [], []>} : vector<16x256xbf16>, vector<256x256xbf16>, vector<16x256xf32> -> vector<16x256xf32>
      %c0_14 = arith.constant 0 : index
      %c0_15 = arith.constant 0 : index
      %16 = vector.load %arg5[%c0_14, %c0_15] : memref<1x256xf32, #tpu.memory_space<vmem>>, vector<1x256xf32>
      %17 = vector.broadcast %16 : vector<1x256xf32> to vector<16x256xf32>
      %18 = arith.addf %15, %17 : vector<16x256xf32>
      %19 = arith.mulf %18, %18 : vector<16x256xf32>
      %cst_16 = arith.constant dense<0.000000e+00> : vector<16xf32>
      %20 = vector.multi_reduction <add>, %19, %cst_16 [1] : vector<16x256xf32> to vector<16xf32>
      %21 = vector.shape_cast %20 : vector<16xf32> to vector<16x1xf32>
      %cst_17 = arith.constant 9.99999996E-13 : f32
      %22 = vector.broadcast %cst_17 : f32 to vector<16x1xf32>
      %23 = arith.addf %21, %22 : vector<16x1xf32>
      %24 = math.rsqrt %23 : vector<16x1xf32>
      %25 = vector.broadcast %24 : vector<16x1xf32> to vector<16x256xf32>
      %26 = arith.mulf %18, %25 : vector<16x256xf32>
      %c0_18 = arith.constant 0 : index
      %c0_19 = arith.constant 0 : index
      %27 = vector.load %arg6[%c0_18, %c0_19] : memref<16x256xf32, #tpu.memory_space<vmem>>, vector<16x256xf32>
      tpu.vector_store %arg6[%c0_18, %c0_19], %26 {strides = array<i32>} : memref<16x256xf32, #tpu.memory_space<vmem>>, vector<16x256xf32>,
    } else {
    }
    return
  }
  func.func @transform_0(%arg0: i32, %arg1: i32) -> (i32, i32) {
    %c0_i32 = arith.constant 0 : i32
    return %arg0, %arg1 : i32, i32
  }
  func.func @transform_1(%arg0: i32, %arg1: i32) -> (i32, i32) {
    %c0_i32 = arith.constant 0 : i32
    %c0_i32_0 = arith.constant 0 : i32
    return %arg1, %c0_i32 : i32, i32
  }
  func.func @transform_2(%arg0: i32, %arg1: i32) -> (i32, i32) {
    %c0_i32 = arith.constant 0 : i32
    %c0_i32_0 = arith.constant 0 : i32
    %c0_i32_1 = arith.constant 0 : i32
    return %c0_i32, %c0_i32_0 : i32, i32
  }
  func.func @transform_3(%arg0: i32, %arg1: i32) -> (i32, i32) {
    %c0_i32 = arith.constant 0 : i32
    %c0_i32_0 = arith.constant 0 : i32
    %c0_i32_1 = arith.constant 0 : i32
    return %c0_i32, %c0_i32_0 : i32, i32
  }
  func.func @transform_4(%arg0: i32, %arg1: i32) -> (i32, i32) {
    %c0_i32 = arith.constant 0 : i32
    %c0_i32_0 = arith.constant 0 : i32
    return %arg0, %c0_i32 : i32, i32
  }
}

module attributes {stable_mosaic.version = 11 : i64} {
  func.func @_triplet_hard_kernel(%arg0: i32, %arg1: memref<8x256xf32, #tpu.memory_space<vmem>>, %arg2: memref<8x256xf32, #tpu.memory_space<vmem>>, %arg3: memref<1x8xi32, #tpu.memory_space<vmem>>, %arg4: memref<1x8xi32, #tpu.memory_space<vmem>>, %arg5: memref<8x128xf32, #tpu.memory_space<vmem>>) attributes {dimension_semantics = [#tpu.dimension_semantics<parallel>], iteration_bounds = array<i64: 1>, scalar_prefetch = 0 : i64, scratch_operands = 0 : i64, tpu.core_type = #tpu.core_type<tc>, window_params = [{transform_indices = @transform_0, window_bounds = array<i64: 8, 256>}, {pipeline_mode = #tpu.pipeline_mode<synchronous>, transform_indices = @transform_1, window_bounds = array<i64: 8, 256>}, {transform_indices = @transform_2, window_bounds = array<i64: 1, 8>}, {pipeline_mode = #tpu.pipeline_mode<synchronous>, transform_indices = @transform_3, window_bounds = array<i64: 1, 8>}, {transform_indices = @transform_4, window_bounds = array<i64: 8, 128>}]} {
    %c0 = arith.constant 0 : index
    %c0_0 = arith.constant 0 : index
    %0 = vector.load %arg1[%c0, %c0_0] : memref<8x256xf32, #tpu.memory_space<vmem>>, vector<8x256xf32>
    %c0_1 = arith.constant 0 : index
    %c0_2 = arith.constant 0 : index
    %1 = vector.load %arg2[%c0_1, %c0_2] : memref<8x256xf32, #tpu.memory_space<vmem>>, vector<8x256xf32>
    %c0_3 = arith.constant 0 : index
    %c0_4 = arith.constant 0 : index
    %2 = vector.load %arg3[%c0_3, %c0_4] : memref<1x8xi32, #tpu.memory_space<vmem>>, vector<1x8xi32>
    %c0_5 = arith.constant 0 : index
    %c0_6 = arith.constant 0 : index
    %3 = vector.load %arg4[%c0_5, %c0_6] : memref<1x8xi32, #tpu.memory_space<vmem>>, vector<1x8xi32>
    %cst = arith.constant dense<0.000000e+00> : vector<8x8xf32>
    %4 = tpu.matmul %0, %1, %cst {dimension_numbers = #tpu.dot_dimension_numbers<[1], [1], [0], [0], [0, 0, 1, 0], [], []>} : vector<8x256xf32>, vector<8x256xf32>, vector<8x8xf32> -> vector<8x8xf32>
    %cst_7 = arith.constant 2.000000e+00 : f32
    %5 = vector.broadcast %cst_7 : f32 to vector<8x8xf32>
    %6 = arith.mulf %5, %4 : vector<8x8xf32>
    %cst_8 = arith.constant 2.000000e+00 : f32
    %7 = vector.broadcast %cst_8 : f32 to vector<8x8xf32>
    %8 = arith.subf %7, %6 : vector<8x8xf32>
    %cst_9 = arith.constant 9.99999996E-13 : f32
    %9 = vector.broadcast %cst_9 : f32 to vector<8x8xf32>
    %10 = arith.maximumf %8, %9 : vector<8x8xf32>
    %11 = tpu.transpose %2, [1, 0] : vector<1x8xi32> -> vector<8x1xi32>
    %c0_i32 = arith.constant 0 : i32
    %12 = vector.broadcast %c0_i32 : i32 to vector<8x1xi32>
    %13 = arith.cmpi sge, %11, %12 : vector<8x1xi32>
    %c0_i32_10 = arith.constant 0 : i32
    %14 = vector.broadcast %c0_i32_10 : i32 to vector<1x8xi32>
    %15 = arith.cmpi sge, %3, %14 : vector<1x8xi32>
    %16 = vector.broadcast %11 : vector<8x1xi32> to vector<8x8xi32>
    %17 = vector.broadcast %3 : vector<1x8xi32> to vector<8x8xi32>
    %18 = arith.cmpi eq, %16, %17 : vector<8x8xi32>
    %19 = vector.broadcast %15 : vector<1x8xi1> to vector<8x8xi1>
    %20 = arith.andi %18, %19 : vector<8x8xi1>
    %cst_11 = arith.constant 0.000000e+00 : f32
    %21 = vector.broadcast %cst_11 : f32 to vector<8x8xf32>
    %22 = arith.select %20, %10, %21 : vector<8x8xi1>, vector<8x8xf32>
    %cst_12 = arith.constant dense<0xFF800000> : vector<8xf32>
    %23 = vector.multi_reduction <maximumf>, %22, %cst_12 [1] : vector<8x8xf32> to vector<8xf32>
    %24 = vector.shape_cast %23 : vector<8xf32> to vector<8x1xf32>
    %cst_13 = arith.constant dense<true> : vector<1x8xi1>
    %25 = arith.xori %15, %cst_13 : vector<1x8xi1>
    %26 = vector.broadcast %25 : vector<1x8xi1> to vector<8x8xi1>
    %27 = arith.ori %20, %26 : vector<8x8xi1>
    %cst_14 = arith.constant 1.000000e+30 : f32
    %28 = vector.broadcast %cst_14 : f32 to vector<8x8xf32>
    %29 = arith.select %27, %28, %10 : vector<8x8xi1>, vector<8x8xf32>
    %cst_15 = arith.constant dense<0x7F800000> : vector<8xf32>
    %30 = vector.multi_reduction <minimumf>, %29, %cst_15 [1] : vector<8x8xf32> to vector<8xf32>
    %31 = vector.shape_cast %30 : vector<8xf32> to vector<8x1xf32>
    %32 = math.sqrt %24 : vector<8x1xf32>
    %33 = math.sqrt %31 : vector<8x1xf32>
    %34 = arith.subf %32, %33 : vector<8x1xf32>
    %cst_16 = arith.constant 3.000000e-01 : f32
    %35 = vector.broadcast %cst_16 : f32 to vector<8x1xf32>
    %36 = arith.addf %34, %35 : vector<8x1xf32>
    %cst_17 = arith.constant 0.000000e+00 : f32
    %37 = vector.broadcast %cst_17 : f32 to vector<8x1xf32>
    %38 = arith.maximumf %36, %37 : vector<8x1xf32>
    %cst_18 = arith.constant 0.000000e+00 : f32
    %39 = vector.broadcast %cst_18 : f32 to vector<8x1xf32>
    %40 = arith.select %13, %38, %39 : vector<8x1xi1>, vector<8x1xf32>
    %41 = vector.shape_cast %40 : vector<8x1xf32> to vector<8x1xf32>
    %42 = vector.broadcast %41 : vector<8x1xf32> to vector<8x128xf32>
    %c0_19 = arith.constant 0 : index
    %c0_20 = arith.constant 0 : index
    %43 = vector.load %arg5[%c0_19, %c0_20] : memref<8x128xf32, #tpu.memory_space<vmem>>, vector<8x128xf32>
    tpu.vector_store %arg5[%c0_19, %c0_20], %42 {strides = array<i32>} : memref<8x128xf32, #tpu.memory_space<vmem>>, vector<8x128xf32>,
    return
  }
  func.func @transform_0(%arg0: i32) -> (i32, i32) {
    %c0_i32 = arith.constant 0 : i32
    %c0_i32_0 = arith.constant 0 : i32
    return %arg0, %c0_i32 : i32, i32
  }
  func.func @transform_1(%arg0: i32) -> (i32, i32) {
    %c0_i32 = arith.constant 0 : i32
    %c0_i32_0 = arith.constant 0 : i32
    %c0_i32_1 = arith.constant 0 : i32
    return %c0_i32, %c0_i32_0 : i32, i32
  }
  func.func @transform_2(%arg0: i32) -> (i32, i32) {
    %c0_i32 = arith.constant 0 : i32
    %c0_i32_0 = arith.constant 0 : i32
    return %c0_i32, %arg0 : i32, i32
  }
  func.func @transform_3(%arg0: i32) -> (i32, i32) {
    %c0_i32 = arith.constant 0 : i32
    %c0_i32_0 = arith.constant 0 : i32
    %c0_i32_1 = arith.constant 0 : i32
    return %c0_i32, %c0_i32_0 : i32, i32
  }
  func.func @transform_4(%arg0: i32) -> (i32, i32) {
    %c0_i32 = arith.constant 0 : i32
    %c0_i32_0 = arith.constant 0 : i32
    return %arg0, %c0_i32 : i32, i32
  }
}

</mosaic_0001>

<bundles_post_ra>
// kernel: reid_loss_forward.3
= control target key start
LH: loop header
LB: loop body
LE: loop exit
PB: predicated region body
PF: predicated region fallthrough
CT: control target
= control target key end

     0   :  { %v170_v3 = vmov 0   ;;  %vm171_vm1 = vmmov 1   ;;  %vm110_vm5 = vcmask 64512   ;;  %s225_s2 = inlined_call_operand.vmem [shape: s32[1,8], index: 2, kind: input, shape index: {}, may-alias: {2,3}]   ;;  %s226_s1 = inlined_call_operand.vmem [shape: f32[8,256], index: 1, kind: input, shape index: {}]   ;;  %s227_s0 = inlined_call_operand.vmem [shape: f32[8,256], index: 0, kind: input, shape index: {}]   ;;  %s228_s3 = inlined_call_operand.vmem [shape: s32[1,8], index: 3, kind: input, shape index: {}, may-alias: {2,3}]   ;;  %s229_s4 = inlined_call_operand.vmem [shape: f32[8,128], index: 4, kind: output, shape index: {}]  }
   0x1   :  { %v21_v0 = vld [vmem:[%s225_s2] sm:$0x1]  ;;  %v20_v2 = vld [vmem:[%s226_s1 + $0x8] sm:$0xff]  ;;  %164 = vset.pattern.permute.xlu2 %v170_v3 }
   0x2   :  { %v19_v1 = vld [vmem:[%s226_s1] sm:$0xff]  ;;  %66 = vxpose.xlu0.b32.start.end [1/1] (short) (narrow) %v21_v0, 8  ;;  %58 = vmatpush.xpose.msra.mxu1 %v20_v2  ;;  %v18_v5 = vld [vmem:[%s227_s0 + $0x8] sm:$0xff] }
   0x3   :  { %38 = vmatpush.xpose.msra.mxu0 %v19_v1  ;;  %v17_v4 = vld [vmem:[%s227_s0] sm:$0xff] }
   0x4   :  { %v22_v9 = vld [vmem:[%s228_s3] sm:$0x1] }
   0x5   :  { %59 = vmatmul.f32.vlgmr.msra.gmra.mxu1 %v18_v5  ;;  %vm99_vm0 = vcmp.ge.s32.totalorder %v22_v9, 0  ;;  %v165_v16 = vld [vmem:[%s228_s3] ss:$0 sm:$0xff] }
   0x6   :  { %39 = vmatmul.f32.vlgmr.msra.gmra.mxu0 %v17_v4  ;;  %v105_v12 = vsel %vm99_vm0, 1, %v170_v3  ;;  %vm114_vm2 = vmxor %vm99_vm0, %vm171_vm1 }
   0x7   :  { %v106_v14 = vperm.slane %v105_v12, 0  ;;  %v115_v15 = vsel %vm114_vm2, 1, %v170_v3 }
   0x8   :  { %v116_v18 = vperm.slane %v115_v15, 0 }
   0x9   :  { %vm107_vm3 = vcmp.eq.s32.totalorder %v106_v14, 1 }
   0xa   :  { %vm117_vm7 = vcmp.eq.s32.totalorder %v116_v18, 1 }
  0x69   :  { %163 = vset.pattern.permute.xlu0 %v170_v3 }
  0x82   :  { %v60_v8 = vpop.f32.mrf.mxu1 }
  0x83   :  { %v40_v7 = vpop.f32.mrf.mxu0 }
  0x84   :  { %v61_v10 = vadd.f32 %v60_v8, %v40_v7 }
  0x86   :  { %v63_v11 = vmul.f32 2.0, %v61_v10 }
  0x88   :  { %v64_v13 = vsub.f32 2.0, %v63_v11 }
  0x8a   :  { %v65_v17 = vmax.f32 %v64_v13, 1e-12 }
  0xa6   :  { %v212_v6 = vpop.trf.xlu0 }
  0xa7   :  { %101 = vperm.xlu0 %163, %v212_v6   ;;  %vm98_vm13 = vcmp.ge.s32.totalorder %v212_v6, 0 }
 0x119   :  { %v102_v19 = vpop.permute.xlu0 %101 }
 0x11a   :  { %vm104_vm4 = vcmp.eq.s32.totalorder %v102_v19, %v165_v16 }
 0x11b   :  { %vm108_vm6 = vmand %vm104_vm4, %vm107_vm3 }
 0x11c   :  { %v109_v20 = vsel %vm108_vm6, %v65_v17, 0.0  ;;  %vm118_vm8 = vmor %vm108_vm6, %vm117_vm7 }
 0x11d   :  { %v111_v21 = vsel %vm110_vm5, %v109_v20, -inf  ;;  %v119_v22 = vsel %vm118_vm8, 1e+30, %v65_v17 }
 0x11e   :  { %112 = vmax.xlane.f32.xlu1 %v111_v21  ;;  %v120_v23 = vsel %vm110_vm5, %v119_v22, inf }
 0x126   :  { %121 = vmin.xlane.f32.xlu1 %v120_v23 }
 0x191   :  { %v113_v24 = vpop.xlane.xlu1 %112 }
 0x192   :  { %166 = vrsqrt.f32 %v113_v24  ;;  %vm130_vm9 = vcmp.eq.f32.partialorder %v113_v24, inf  ;;  %v133_v41 = vand.u32 2147483648, %v113_v24  ;;  %vm132_vm11 = vcmp.eq.f32.partialorder %v113_v24, 0.0 }
 0x198   :  { %v167_v25 = vpop.eup %166 }
 0x199   :  { %v124_v26 = vmul.f32 %v167_v25, %v113_v24  ;;  %v122_v27 = vpop.xlane.xlu1 %121 }
 0x19a   :  { %168 = vrsqrt.f32 %v122_v27  ;;  %vm142_vm10 = vcmp.eq.f32.partialorder %v122_v27, inf  ;;  %v145_v42 = vand.u32 2147483648, %v122_v27  ;;  %vm144_vm12 = vcmp.eq.f32.partialorder %v122_v27, 0.0 }
 0x19b   :  { %v125_v28 = vmul.f32 %v167_v25, %v124_v26 }
 0x19d   :  { %v126_v29 = vmul.f32 0.5, %v125_v28 }
 0x19f   :  { %v127_v30 = vsub.f32 1.5, %v126_v29 }
 0x1a0   :  { %v169_v31 = vpop.eup %168 }
 0x1a1   :  { %v136_v32 = vmul.f32 %v169_v31, %v122_v27  ;;  %v128_v34 = vmul.f32 %v167_v25, %v127_v30 }
 0x1a3   :  { %v137_v33 = vmul.f32 %v169_v31, %v136_v32  ;;  %v129_v37 = vmul.f32 %v128_v34, %v113_v24 }
 0x1a5   :  { %v138_v35 = vmul.f32 0.5, %v137_v33  ;;  %v131_v39 = vsel %vm130_vm9, %v113_v24, %v129_v37 }
 0x1a6   :  { %v134_v44 = vsel %vm132_vm11, %v133_v41, %v131_v39 }
 0x1a7   :  { %v139_v36 = vsub.f32 1.5, %v138_v35 }
 0x1a9   :  { %v140_v38 = vmul.f32 %v169_v31, %v139_v36 }
 0x1ab   :  { %v141_v40 = vmul.f32 %v140_v38, %v122_v27 }
 0x1ad   :  { %v143_v43 = vsel %vm142_vm10, %v122_v27, %v141_v40 }
 0x1ae   :  { %v146_v45 = vsel %vm144_vm12, %v145_v42, %v143_v43 }
 0x1af   :  { %v147_v46 = vsub.f32 %v134_v44, %v146_v45 }
 0x1b1   :  { %v148_v47 = vadd.f32 0.3, %v147_v46 }
 0x1b3   :  { %v149_v48 = vmax.f32 %v148_v47, 0.0 }
 0x1b5   :  { %v150_v49 = vsel %vm98_vm13, %v149_v48, 0.0 }
 0x1b6   :  { %153 = vperm.xlu2 %164, %v150_v49  }
 0x210   :  { %v154_v50 = vpop.permute.xlu2 %153 }
 0x211   :  { %156 = vst [vmem:[%s229_s4] sm:$0xff] %v154_v50 }

// kernel: reid_loss_forward.2
= control target key start
LH: loop header
LB: loop body
LE: loop exit
PB: predicated region body
PF: predicated region fallthrough
CT: control target
= control target key end

     0   :  { %s1414_s15 = smov 0   ;;  %s1416_s16 = smov 0   ;;  %s1760_s0 = inlined_call_operand.vmem [shape: bf16[16,768], index: 0, kind: input, shape index: {}]   ;;  %s1761_s1 = inlined_call_operand.vmem [shape: bf16[768,256], index: 1, kind: input, shape index: {}]   ;;  %s1762_s2 = inlined_call_operand.vmem [shape: bf16[256,256], index: 2, kind: input, shape index: {}]   ;;  %s1763_s3 = inlined_call_operand.vmem [shape: f32[1,256], index: 3, kind: input, shape index: {}]   ;;  %s1764_s4 = inlined_call_operand.vmem [shape: f32[16,256], index: 4, kind: output, shape index: {}]  }
   0x1   :  { %s1418_s17 = smov 0   ;;  %s1420_s18 = smov 0  }
   0x2   :  { %s1422_s19 = smov 0  }
   0x3 LB: > { %s23_s20 = sadd.s32 1, %s1382_s18  ;;  %p42_p1 = scmp.ne.s32.totalorder %s1374_s16, %s1370_s15  ;;  %s1386_s19 = sphi %s1422_s19, %s14_s19   ;;  %s1382_s18 = sphi %s1420_s18, %s1768_s18   ;;  %s1378_s17 = sphi %s1418_s17, %s1767_s17   ;;  %s1374_s16 = sphi %s1416_s16, %s1766_s16   ;;  %s1370_s15 = sphi %s1414_s15, %s1765_s15  }
   0x4   : > { %p24_p0 = scmp.ge.s32.totalorder %s23_s20, 3  ;;  %p43_p2 = scmp.eq.s32.totalorder %s1386_s19, 0 }
   0x5   : > { %s35_s22 = sadd.s32 1, %s1374_s16  ;;  %p956_p5 = scmp.ge.s32.totalorder %s1386_s19, 3 }
   0x6   : > { %s1770_s20 = smov (%p24_p0, %s23_s20), 0  ;;  %p44_p3 = por %p43_p2, %p42_p1 }
   0x7   : > { %s31_s21 = ssub.s32 %s1382_s18, %s1770_s20  ;;  %168 = sbr.rel (%p956_p5) target bundleno = 18 (0x12), region = 24 }
   0x8   : > { %p33_p4 = scmp.eq.s32.totalorder %s31_s21, 0 }
   0xa   : > { %s1449_s23 = scalar_select %p33_p4, %s1374_s16, %s35_s22  }
   0xc   : > { %171 = sbr.rel (!%p44_p3) target bundleno = 18 (0x12), region = 28  ;;  %s173_s24 = sand.u32 (%p44_p3), 1, %s1374_s16  }
   0xd   : > { %s1235_s25 = sshll.u32 (%p44_p3), %s1382_s18, 3  ;;  %s957_s26 = sshll.u32 (%p44_p3), %s173_s24, 4 }
   0xe   : > { %s181_s29 = scalar_lea.vmem (%p44_p3), %s1760_s0, %s1235_s25  ;;  %s175_s30 = scalar_lea.vmem (%p44_p3), [#allocation3], %s957_s26 }
   0xf   : > { %v212_v0 = vld [vmem:[%s181_s29] sm:$0xff] (%p44_p3)  ;;  %v214_v1 = vld [vmem:[%s181_s29 + $0x18] sm:$0xff] (%p44_p3) }
  0x10   : > { %213 = vst [vmem:[%s175_s30] sm:$0xff] (%p44_p3), %v212_v0 }
  0x11   : > { %215 = vst [vmem:[%s175_s30 + $0x8] sm:$0xff] %v214_v1 }
  0x12 PF: > { %p960_p6 = scmp.ge.s32.totalorder %s1386_s19, 1  ;;  %p230_p7 = scmp.lt.s32.totalorder %s1386_s19, 4 }
  0x14   : > { %p231_p8 = pnand %p960_p6, %p230_p7 }
  0x15   : > { %s237_s5 = sand.u32 (!%p231_p8), 1, %s1370_s15   ;;  %s962_s6 = sshll.u32 (!%p231_p8), %s1378_s17, 5 }
  0x16   : > { %234 = sbr.rel (%p231_p8) target bundleno = 541 (0x21d), region = 70  ;;  %s961_s7 = sshll.u32 (!%p231_p8), %s237_s5, 4 }
  0x17   : > { %p272_p9 = scmp.lt.s32.totalorder (!%p231_p8), %s962_s6, 95  ;;  %s1466_s12 = scalar_lea.vmem (!%p231_p8), [#allocation3], %s961_s7 }
  0x18   : > { %p965_p10 = scmp.ne.s32.totalorder (!%p231_p8), %s1378_s17, 0 }
  0x1b   : > { %s1772_s6 = smov (!%p272_p9, %s962_s6), 95  ;;  %288 = sbr.rel (%p965_p10) target bundleno = 37 (0x25), region = 78 }
  0x1c   : > { %s1236_s8 = sshll.u32 %s1772_s6, 3 }
  0x1d   : > { %s1464_s11 = scalar_lea.vmem %s1761_s1, %s1236_s8 }
  0x20   : > { %v1388_v2 = vmov 0.0  }
  0x21   : > { %289 = vst [vmem:[#allocation2 + $0x10] sm:$0xff] %v1388_v2 }
  0x22   : > { %290 = vst [vmem:[#allocation2] sm:$0xff] %v1388_v2 }
  0x23   : > { %291 = vst [vmem:[#allocation2 + $0x18] sm:$0xff] %v1388_v2 }
  0x24   : > { %292 = vst [vmem:[#allocation2 + $0x8] sm:$0xff] %v1388_v2 }
  0x25 PF: > { %v1032_v3 = vld [vmem:[%s1464_s11 + $0x70] sm:$0xf]  ;;  %v1254_v4 = vld [vmem:[%s1464_s11 + $0x74] sm:$0xf0]  ;;  %v1253_v8 = vld [vmem:[%s1464_s11 + $0x74] sm:$0xf] }
  0x26   : > { %v1096_v5 = vld [vmem:[%s1464_s11 + $0xf0] sm:$0xf]  ;;  %v1033_v6 = vor.u32 %v1254_v4, %v1032_v3  ;;  %v1270_v7 = vld [vmem:[%s1464_s11 + $0xf4] sm:$0xf0]  ;;  %v1034_v9 = vld [vmem:[%s1464_s11 + $0x78] sm:$0xf0] }
  0x27   : > { %v1097_v10 = vor.u32 %v1270_v7, %v1096_v5  ;;  %v1037_v11 = vor.u32 %v1253_v8, %v1034_v9  ;;  %v1269_v12 = vld [vmem:[%s1464_s11 + $0xf4] sm:$0xf]  ;;  %v1098_v13 = vld [vmem:[%s1464_s11 + $0xf8] sm:$0xf0]  ;;  %v1024_v14 = vld [vmem:[%s1464_s11 + $0x60] sm:$0xf] }
  0x28   : > { %501 = vmatpush.bf16.msra.mxu0 %v1033_v6  ;;  %v1101_v15 = vor.u32 %v1269_v12, %v1098_v13  ;;  %v1252_v16 = vld [vmem:[%s1464_s11 + $0x64] sm:$0xf0]  ;;  %v1088_v17 = vld [vmem:[%s1464_s11 + $0xe0] sm:$0xf]  ;;  %v1251_v21 = vld [vmem:[%s1464_s11 + $0x64] sm:$0xf] }
  0x29   : > { %v1268_v18 = vld [vmem:[%s1464_s11 + $0xe4] sm:$0xf0]  ;;  %515 = vmatpush.bf16.msra.mxu1 %v1097_v10  ;;  %529 = vmatpush.bf16.msra.mxu2 %v1037_v11  ;;  %v1025_v19 = vor.u32 %v1252_v16, %v1024_v14  ;;  %v1026_v22 = vld [vmem:[%s1464_s11 + $0x68] sm:$0xf0]  ;;  %v1267_v23 = vld [vmem:[%s1464_s11 + $0xe4] sm:$0xf] }
  0x2a   : > { %v1089_v20 = vor.u32 %v1268_v18, %v1088_v17  ;;  %543 = vmatpush.bf16.msra.mxu3 %v1101_v15  ;;  %v1029_v24 = vor.u32 %v1251_v21, %v1026_v22  ;;  %v1090_v25 = vld [vmem:[%s1464_s11 + $0xe8] sm:$0xf0]  ;;  %v1016_v26 = vld [vmem:[%s1464_s11 + $0x50] sm:$0xf]  ;;  %v1250_v27 = vld [vmem:[%s1464_s11 + $0x54] sm:$0xf0] }
  0x2b   : > { %v1093_v28 = vor.u32 %v1267_v23, %v1090_v25  ;;  %v1080_v29 = vld [vmem:[%s1464_s11 + $0xd0] sm:$0xf]  ;;  %v1266_v30 = vld [vmem:[%s1464_s11 + $0xd4] sm:$0xf0]  ;;  %v1249_v31 = vld [vmem:[%s1464_s11 + $0x54] sm:$0xf]  ;;  %v1017_v32 = vor.u32 %v1250_v27, %v1016_v26 }
  0x2c   : > { %502 = vmatpush.bf16.msra.mxu0 %v1025_v19  ;;  %v1018_v33 = vld [vmem:[%s1464_s11 + $0x58] sm:$0xf0]  ;;  %v1265_v34 = vld [vmem:[%s1464_s11 + $0xd4] sm:$0xf]  ;;  %v1081_v36 = vor.u32 %v1266_v30, %v1080_v29  ;;  %v1008_v38 = vld [vmem:[%s1464_s11 + $0x40] sm:$0xf] }
  0x2d   : > { %v1082_v35 = vld [vmem:[%s1464_s11 + $0xd8] sm:$0xf0]  ;;  %516 = vmatpush.bf16.msra.mxu1 %v1089_v20  ;;  %530 = vmatpush.bf16.msra.mxu2 %v1029_v24  ;;  %v1021_v37 = vor.u32 %v1249_v31, %v1018_v33  ;;  %v1248_v39 = vld [vmem:[%s1464_s11 + $0x44] sm:$0xf0]  ;;  %v1072_v40 = vld [vmem:[%s1464_s11 + $0xc0] sm:$0xf] }
  0x2e   : > { %544 = vmatpush.bf16.msra.mxu3 %v1093_v28  ;;  %v1085_v41 = vor.u32 %v1265_v34, %v1082_v35  ;;  %v1264_v42 = vld [vmem:[%s1464_s11 + $0xc4] sm:$0xf0]  ;;  %v1247_v43 = vld [vmem:[%s1464_s11 + $0x44] sm:$0xf]  ;;  %v1010_v44 = vld [vmem:[%s1464_s11 + $0x48] sm:$0xf0]  ;;  %v1009_v47 = vor.u32 %v1248_v39, %v1008_v38 }
  0x2f   : > { %v1263_v45 = vld [vmem:[%s1464_s11 + $0xc4] sm:$0xf]  ;;  %v1074_v46 = vld [vmem:[%s1464_s11 + $0xc8] sm:$0xf0]  ;;  %v1073_v48 = vor.u32 %v1264_v42, %v1072_v40  ;;  %v1013_v49 = vor.u32 %v1247_v43, %v1010_v44  ;;  %v1000_v50 = vld [vmem:[%s1464_s11 + $0x30] sm:$0xf] }
  0x30   : > { %503 = vmatpush.bf16.msra.mxu0 %v1017_v32  ;;  %v1246_v51 = vld [vmem:[%s1464_s11 + $0x34] sm:$0xf0]  ;;  %v1064_v52 = vld [vmem:[%s1464_s11 + $0xb0] sm:$0xf]  ;;  %v1077_v53 = vor.u32 %v1263_v45, %v1074_v46  ;;  %v1245_v55 = vld [vmem:[%s1464_s11 + $0x34] sm:$0xf] }
  0x31   : > { %517 = vmatpush.bf16.msra.mxu1 %v1081_v36  ;;  %531 = vmatpush.bf16.msra.mxu2 %v1021_v37  ;;  %v1262_v54 = vld [vmem:[%s1464_s11 + $0xb4] sm:$0xf0]  ;;  %v1002_v56 = vld [vmem:[%s1464_s11 + $0x38] sm:$0xf0]  ;;  %v1261_v57 = vld [vmem:[%s1464_s11 + $0xb4] sm:$0xf]  ;;  %v1001_v59 = vor.u32 %v1246_v51, %v1000_v50 }
  0x32   : > { %545 = vmatpush.bf16.msra.mxu3 %v1085_v41  ;;  %v1066_v58 = vld [vmem:[%s1464_s11 + $0xb8] sm:$0xf0]  ;;  %v1065_v60 = vor.u32 %v1262_v54, %v1064_v52  ;;  %v1005_v61 = vor.u32 %v1245_v55, %v1002_v56  ;;  %v992_v62 = vld [vmem:[%s1464_s11 + $0x20] sm:$0xf]  ;;  %v1244_v63 = vld [vmem:[%s1464_s11 + $0x24] sm:$0xf0] }
  0x33   : > { %v1056_v0 = vld [vmem:[%s1464_s11 + $0xa0] sm:$0xf]  ;;  %v1069_v1 = vor.u32 %v1261_v57, %v1066_v58  ;;  %v1260_v2 = vld [vmem:[%s1464_s11 + $0xa4] sm:$0xf0]  ;;  %v1243_v3 = vld [vmem:[%s1464_s11 + $0x24] sm:$0xf]  ;;  %v993_v7 = vor.u32 %v1244_v63, %v992_v62 }
  0x34   : > { %504 = vmatpush.bf16.msra.mxu0 %v1009_v47  ;;  %v994_v4 = vld [vmem:[%s1464_s11 + $0x28] sm:$0xf0]  ;;  %v1259_v5 = vld [vmem:[%s1464_s11 + $0xa4] sm:$0xf]  ;;  %v1057_v8 = vor.u32 %v1260_v2, %v1056_v0  ;;  %v984_v10 = vld [vmem:[%s1464_s11 + $0x10] sm:$0xf] }
  0x35   : > { %518 = vmatpush.bf16.msra.mxu1 %v1073_v48  ;;  %532 = vmatpush.bf16.msra.mxu2 %v1013_v49  ;;  %v1058_v6 = vld [vmem:[%s1464_s11 + $0xa8] sm:$0xf0]  ;;  %v997_v9 = vor.u32 %v1243_v3, %v994_v4  ;;  %v1242_v11 = vld [vmem:[%s1464_s11 + $0x14] sm:$0xf0]  ;;  %v1048_v12 = vld [vmem:[%s1464_s11 + $0x90] sm:$0xf] }
  0x36   : > { %546 = vmatpush.bf16.msra.mxu3 %v1077_v53  ;;  %v1061_v13 = vor.u32 %v1259_v5, %v1058_v6  ;;  %v1258_v14 = vld [vmem:[%s1464_s11 + $0x94] sm:$0xf0]  ;;  %v1241_v15 = vld [vmem:[%s1464_s11 + $0x14] sm:$0xf]  ;;  %v986_v16 = vld [vmem:[%s1464_s11 + $0x18] sm:$0xf0]  ;;  %v985_v19 = vor.u32 %v1242_v11, %v984_v10 }
  0x37   : > { %v1257_v17 = vld [vmem:[%s1464_s11 + $0x94] sm:$0xf]  ;;  %v1050_v18 = vld [vmem:[%s1464_s11 + $0x98] sm:$0xf0]  ;;  %v1049_v20 = vor.u32 %v1258_v14, %v1048_v12  ;;  %v989_v21 = vor.u32 %v1241_v15, %v986_v16  ;;  %v976_v22 = vld [vmem:[%s1464_s11] sm:$0xf] }
  0x38   : > { %505 = vmatpush.bf16.msra.mxu0 %v1001_v59  ;;  %v1240_v23 = vld [vmem:[%s1464_s11 + $0x4] sm:$0xf0]  ;;  %v1040_v24 = vld [vmem:[%s1464_s11 + $0x80] sm:$0xf]  ;;  %v1053_v25 = vor.u32 %v1257_v17, %v1050_v18  ;;  %v1239_v27 = vld [vmem:[%s1464_s11 + $0x4] sm:$0xf] }
  0x39   : > { %519 = vmatpush.bf16.msra.mxu1 %v1065_v60  ;;  %533 = vmatpush.bf16.msra.mxu2 %v1005_v61  ;;  %v1256_v26 = vld [vmem:[%s1464_s11 + $0x84] sm:$0xf0]  ;;  %v978_v28 = vld [vmem:[%s1464_s11 + $0x8] sm:$0xf0]  ;;  %v1255_v29 = vld [vmem:[%s1464_s11 + $0x84] sm:$0xf]  ;;  %v977_v31 = vor.u32 %v1240_v23, %v976_v22 }
  0x3a   : > { %547 = vmatpush.bf16.msra.mxu3 %v1069_v1  ;;  %v1042_v30 = vld [vmem:[%s1464_s11 + $0x88] sm:$0xf0]  ;;  %v968_v32 = vld [vmem:[%s1466_s12] sm:$0xf]  ;;  %v1238_v33 = vld [vmem:[%s1466_s12 + $0x4] sm:$0xf0]  ;;  %v1041_v34 = vor.u32 %v1256_v26, %v1040_v24  ;;  %v981_v35 = vor.u32 %v1239_v27, %v978_v28 }
  0x3b   : > { %v1237_v36 = vld [vmem:[%s1466_s12 + $0x4] sm:$0xf]  ;;  %v970_v37 = vld [vmem:[%s1466_s12 + $0x8] sm:$0xf0]  ;;  %v1045_v38 = vor.u32 %v1255_v29, %v1042_v30  ;;  %v969_v39 = vor.u32 %v1238_v33, %v968_v32  ;;  %p1102_p11 = scmp.ne.s32.totalorder %s1378_s17, 2 }
  0x3c   : > { %506 = vmatpush.bf16.msra.mxu0 %v993_v7  ;;  %v973_v40 = vor.u32 %v1237_v36, %v970_v37  ;;  %v293_v42 = vld [vmem:[#allocation2 + $0x10] sm:$0xff]  ;;  %v294_v47 = vld [vmem:[#allocation2] sm:$0xff]  ;;  %v295_v51 = vld [vmem:[#allocation2 + $0x18] sm:$0xff] }
  0x3d   : > { %520 = vmatpush.bf16.msra.mxu1 %v1057_v8  ;;  %534 = vmatpush.bf16.msra.mxu2 %v997_v9  ;;  %v296_v57 = vld [vmem:[#allocation2 + $0x8] sm:$0xff] }
  0x3e   : > { %548 = vmatpush.bf16.msra.mxu3 %v1061_v13 }
  0x40   : > { %507 = vmatpush.bf16.msra.mxu0 %v985_v19 }
  0x41   : > { %521 = vmatpush.bf16.msra.mxu1 %v1049_v20  ;;  %535 = vmatpush.bf16.msra.mxu2 %v989_v21 }
  0x42   : > { %549 = vmatpush.bf16.msra.mxu3 %v1053_v25 }
  0x44   : > { %508 = vmatpush.bf16.msra.mxu0 %v977_v31 }
  0x45   : > { %522 = vmatpush.bf16.msra.mxu1 %v1041_v34  ;;  %536 = vmatpush.bf16.msra.mxu2 %v981_v35 }
  0x46   : > { %550 = vmatpush.bf16.msra.mxu3 %v1045_v38 }
  0x47   : > { %509 = vmatmul.bf16.vlgmr.msra.gmra.mxu0 %v969_v39 }
  0x48   : > { %523 = vmatmul.bf16.vlgmr.msra.gmra.mxu1 %v973_v40  ;;  %537 = vmatmul.bf16.vlgmr.msra.gmra.mxu2 %v969_v39 }
  0x49   : > { %551 = vmatmul.bf16.vlgmr.msra.gmra.mxu3 %v973_v40 }
  0xc4   : > { %v510_v41 = vpop.f32.mrf.mxu0 }
  0xc5   : > { %v524_v43 = vpop.f32.mrf.mxu1 }
  0xc6   : > { %v525_v44 = vadd.f32 %v524_v43, %v510_v41 }
  0xc8   : > { %v557_v45 = vadd.f32 %v525_v44, %v293_v42 }
  0xca   : > { %561 = vst [vmem:[#allocation2 + $0x10] sm:$0xff] %v557_v45 }
  0xcb   : > { %v538_v46 = vpop.f32.mrf.mxu2 }
  0xcc   : > { %v552_v48 = vpop.f32.mrf.mxu3  ;;  %v512_v49 = vpop.f32.mrf.mxu0 }
  0xcd   : > { %v553_v50 = vadd.f32 %v552_v48, %v538_v46  ;;  %v526_v52 = vpop.f32.mrf.mxu1 }
  0xce   : > { %v527_v53 = vadd.f32 %v526_v52, %v512_v49 }
  0xcf   : > { %v558_v54 = vadd.f32 %v553_v50, %v294_v47 }
  0xd0   : > { %v559_v55 = vadd.f32 %v527_v53, %v295_v51 }
  0xd1   : > { %562 = vst [vmem:[#allocation2] sm:$0xff] %v558_v54 }
  0xd2   : > { %563 = vst [vmem:[#allocation2 + $0x18] sm:$0xff] %v559_v55 }
  0xd3   : > { %v540_v56 = vpop.f32.mrf.mxu2 }
  0xd4   : > { %v554_v58 = vpop.f32.mrf.mxu3 }
  0xd5   : > { %v555_v59 = vadd.f32 %v554_v58, %v540_v56  ;;  %568 = sbr.rel (%p1102_p11) target bundleno = 541 (0x21d), region = 82 }
  0xd7   : > { %v560_v60 = vadd.f32 %v555_v59, %v296_v57 }
  0xd9   : > { %564 = vst [vmem:[#allocation2 + $0x8] sm:$0xff] %v560_v60 }
  0xda   : > { %v1161_v61 = vld [vmem:[%s1762_s2 + $0x70] sm:$0xf]  ;;  %v1286_v62 = vld [vmem:[%s1762_s2 + $0x74] sm:$0xf0]  ;;  %v1285_v2 = vld [vmem:[%s1762_s2 + $0x74] sm:$0xf] }
  0xdb   : > { %v1225_v63 = vld [vmem:[%s1762_s2 + $0xf0] sm:$0xf]  ;;  %v1162_v0 = vor.u32 %v1286_v62, %v1161_v61  ;;  %v1302_v1 = vld [vmem:[%s1762_s2 + $0xf4] sm:$0xf0]  ;;  %v1163_v3 = vld [vmem:[%s1762_s2 + $0x78] sm:$0xf0] }
  0xdc   : > { %v1226_v4 = vor.u32 %v1302_v1, %v1225_v63  ;;  %v1166_v5 = vor.u32 %v1285_v2, %v1163_v3  ;;  %v1301_v6 = vld [vmem:[%s1762_s2 + $0xf4] sm:$0xf]  ;;  %v1227_v7 = vld [vmem:[%s1762_s2 + $0xf8] sm:$0xf0]  ;;  %v1153_v8 = vld [vmem:[%s1762_s2 + $0x60] sm:$0xf] }
  0xdd   : > { %773 = vmatpush.bf16.msra.mxu0 %v1162_v0  ;;  %v1230_v9 = vor.u32 %v1301_v6, %v1227_v7  ;;  %v1284_v10 = vld [vmem:[%s1762_s2 + $0x64] sm:$0xf0]  ;;  %v1217_v11 = vld [vmem:[%s1762_s2 + $0xe0] sm:$0xf]  ;;  %v1283_v15 = vld [vmem:[%s1762_s2 + $0x64] sm:$0xf] }
  0xde   : > { %v1300_v12 = vld [vmem:[%s1762_s2 + $0xe4] sm:$0xf0]  ;;  %787 = vmatpush.bf16.msra.mxu1 %v1226_v4  ;;  %801 = vmatpush.bf16.msra.mxu2 %v1166_v5  ;;  %v1154_v13 = vor.u32 %v1284_v10, %v1153_v8  ;;  %v1155_v16 = vld [vmem:[%s1762_s2 + $0x68] sm:$0xf0]  ;;  %v1299_v17 = vld [vmem:[%s1762_s2 + $0xe4] sm:$0xf] }
  0xdf   : > { %v1218_v14 = vor.u32 %v1300_v12, %v1217_v11  ;;  %815 = vmatpush.bf16.msra.mxu3 %v1230_v9  ;;  %v1158_v18 = vor.u32 %v1283_v15, %v1155_v16  ;;  %v1219_v19 = vld [vmem:[%s1762_s2 + $0xe8] sm:$0xf0]  ;;  %v1145_v20 = vld [vmem:[%s1762_s2 + $0x50] sm:$0xf]  ;;  %v1282_v21 = vld [vmem:[%s1762_s2 + $0x54] sm:$0xf0] }
  0xe0   : > { %v1222_v22 = vor.u32 %v1299_v17, %v1219_v19  ;;  %v1209_v23 = vld [vmem:[%s1762_s2 + $0xd0] sm:$0xf]  ;;  %v1298_v24 = vld [vmem:[%s1762_s2 + $0xd4] sm:$0xf0]  ;;  %v1281_v25 = vld [vmem:[%s1762_s2 + $0x54] sm:$0xf]  ;;  %v1146_v26 = vor.u32 %v1282_v21, %v1145_v20 }
  0xe1   : > { %774 = vmatpush.bf16.msra.mxu0 %v1154_v13  ;;  %v1147_v27 = vld [vmem:[%s1762_s2 + $0x58] sm:$0xf0]  ;;  %v1297_v28 = vld [vmem:[%s1762_s2 + $0xd4] sm:$0xf]  ;;  %v1210_v30 = vor.u32 %v1298_v24, %v1209_v23  ;;  %v1137_v32 = vld [vmem:[%s1762_s2 + $0x40] sm:$0xf] }
  0xe2   : > { %v1211_v29 = vld [vmem:[%s1762_s2 + $0xd8] sm:$0xf0]  ;;  %788 = vmatpush.bf16.msra.mxu1 %v1218_v14  ;;  %802 = vmatpush.bf16.msra.mxu2 %v1158_v18  ;;  %v1150_v31 = vor.u32 %v1281_v25, %v1147_v27  ;;  %v1280_v33 = vld [vmem:[%s1762_s2 + $0x44] sm:$0xf0]  ;;  %v1201_v34 = vld [vmem:[%s1762_s2 + $0xc0] sm:$0xf] }
  0xe3   : > { %816 = vmatpush.bf16.msra.mxu3 %v1222_v22  ;;  %v1214_v35 = vor.u32 %v1297_v28, %v1211_v29  ;;  %v1296_v36 = vld [vmem:[%s1762_s2 + $0xc4] sm:$0xf0]  ;;  %v1279_v37 = vld [vmem:[%s1762_s2 + $0x44] sm:$0xf]  ;;  %v1139_v38 = vld [vmem:[%s1762_s2 + $0x48] sm:$0xf0]  ;;  %v1138_v41 = vor.u32 %v1280_v33, %v1137_v32 }
  0xe4   : > { %v1295_v39 = vld [vmem:[%s1762_s2 + $0xc4] sm:$0xf]  ;;  %v1203_v40 = vld [vmem:[%s1762_s2 + $0xc8] sm:$0xf0]  ;;  %v1202_v42 = vor.u32 %v1296_v36, %v1201_v34  ;;  %v1142_v43 = vor.u32 %v1279_v37, %v1139_v38  ;;  %v1129_v44 = vld [vmem:[%s1762_s2 + $0x30] sm:$0xf] }
  0xe5   : > { %775 = vmatpush.bf16.msra.mxu0 %v1146_v26  ;;  %v1278_v45 = vld [vmem:[%s1762_s2 + $0x34] sm:$0xf0]  ;;  %v1193_v46 = vld [vmem:[%s1762_s2 + $0xb0] sm:$0xf]  ;;  %v1206_v47 = vor.u32 %v1295_v39, %v1203_v40  ;;  %v1277_v49 = vld [vmem:[%s1762_s2 + $0x34] sm:$0xf] }
  0xe6   : > { %789 = vmatpush.bf16.msra.mxu1 %v1210_v30  ;;  %803 = vmatpush.bf16.msra.mxu2 %v1150_v31  ;;  %v1294_v48 = vld [vmem:[%s1762_s2 + $0xb4] sm:$0xf0]  ;;  %v1131_v50 = vld [vmem:[%s1762_s2 + $0x38] sm:$0xf0]  ;;  %v1293_v51 = vld [vmem:[%s1762_s2 + $0xb4] sm:$0xf]  ;;  %v1130_v53 = vor.u32 %v1278_v45, %v1129_v44 }
  0xe7   : > { %817 = vmatpush.bf16.msra.mxu3 %v1214_v35  ;;  %v1195_v52 = vld [vmem:[%s1762_s2 + $0xb8] sm:$0xf0]  ;;  %v1194_v54 = vor.u32 %v1294_v48, %v1193_v46  ;;  %v1134_v55 = vor.u32 %v1277_v49, %v1131_v50  ;;  %v1121_v56 = vld [vmem:[%s1762_s2 + $0x20] sm:$0xf]  ;;  %v1276_v57 = vld [vmem:[%s1762_s2 + $0x24] sm:$0xf0] }
  0xe8   : > { %v1185_v58 = vld [vmem:[%s1762_s2 + $0xa0] sm:$0xf]  ;;  %v1198_v59 = vor.u32 %v1293_v51, %v1195_v52  ;;  %v1292_v60 = vld [vmem:[%s1762_s2 + $0xa4] sm:$0xf0]  ;;  %v1275_v61 = vld [vmem:[%s1762_s2 + $0x24] sm:$0xf]  ;;  %v1122_v1 = vor.u32 %v1276_v57, %v1121_v56 }
  0xe9   : > { %776 = vmatpush.bf16.msra.mxu0 %v1138_v41  ;;  %v1123_v62 = vld [vmem:[%s1762_s2 + $0x28] sm:$0xf0]  ;;  %v1291_v63 = vld [vmem:[%s1762_s2 + $0xa4] sm:$0xf]  ;;  %v1186_v2 = vor.u32 %v1292_v60, %v1185_v58  ;;  %v1113_v4 = vld [vmem:[%s1762_s2 + $0x10] sm:$0xf] }
  0xea   : > { %790 = vmatpush.bf16.msra.mxu1 %v1202_v42  ;;  %804 = vmatpush.bf16.msra.mxu2 %v1142_v43  ;;  %v1187_v0 = vld [vmem:[%s1762_s2 + $0xa8] sm:$0xf0]  ;;  %v1126_v3 = vor.u32 %v1275_v61, %v1123_v62  ;;  %v1274_v5 = vld [vmem:[%s1762_s2 + $0x14] sm:$0xf0]  ;;  %v1177_v6 = vld [vmem:[%s1762_s2 + $0x90] sm:$0xf] }
  0xeb   : > { %818 = vmatpush.bf16.msra.mxu3 %v1206_v47  ;;  %v1190_v7 = vor.u32 %v1291_v63, %v1187_v0  ;;  %v1290_v8 = vld [vmem:[%s1762_s2 + $0x94] sm:$0xf0]  ;;  %v1273_v9 = vld [vmem:[%s1762_s2 + $0x14] sm:$0xf]  ;;  %v1115_v10 = vld [vmem:[%s1762_s2 + $0x18] sm:$0xf0]  ;;  %v1114_v13 = vor.u32 %v1274_v5, %v1113_v4 }
  0xec   : > { %v1289_v11 = vld [vmem:[%s1762_s2 + $0x94] sm:$0xf]  ;;  %v1179_v12 = vld [vmem:[%s1762_s2 + $0x98] sm:$0xf0]  ;;  %v1178_v14 = vor.u32 %v1290_v8, %v1177_v6  ;;  %v1118_v15 = vor.u32 %v1273_v9, %v1115_v10  ;;  %v1105_v16 = vld [vmem:[%s1762_s2] sm:$0xf] }
  0xed   : > { %777 = vmatpush.bf16.msra.mxu0 %v1130_v53  ;;  %v1272_v17 = vld [vmem:[%s1762_s2 + $0x4] sm:$0xf0]  ;;  %v1169_v18 = vld [vmem:[%s1762_s2 + $0x80] sm:$0xf]  ;;  %v1182_v19 = vor.u32 %v1289_v11, %v1179_v12  ;;  %v1271_v21 = vld [vmem:[%s1762_s2 + $0x4] sm:$0xf] }
  0xee   : > { %791 = vmatpush.bf16.msra.mxu1 %v1194_v54  ;;  %805 = vmatpush.bf16.msra.mxu2 %v1134_v55  ;;  %v1288_v20 = vld [vmem:[%s1762_s2 + $0x84] sm:$0xf0]  ;;  %v1107_v22 = vld [vmem:[%s1762_s2 + $0x8] sm:$0xf0]  ;;  %v1287_v23 = vld [vmem:[%s1762_s2 + $0x84] sm:$0xf]  ;;  %v1106_v25 = vor.u32 %v1272_v17, %v1105_v16 }
  0xef   : > { %819 = vmatpush.bf16.msra.mxu3 %v1198_v59  ;;  %v1171_v24 = vld [vmem:[%s1762_s2 + $0x88] sm:$0xf0]  ;;  %v569_v26 = vld [vmem:[#allocation2 + $0x10] sm:$0xff]  ;;  %v571_v27 = vld [vmem:[#allocation2 + $0x18] sm:$0xff]  ;;  %v1170_v28 = vor.u32 %v1288_v20, %v1169_v18  ;;  %v1110_v29 = vor.u32 %v1271_v21, %v1107_v22 }
  0xf0   : > { %v570_v30 = vld [vmem:[#allocation2] sm:$0xff]  ;;  %v572_v31 = vld [vmem:[#allocation2 + $0x8] sm:$0xff]  ;;  %v1174_v32 = vor.u32 %v1287_v23, %v1171_v24  ;;  %v573_v33 = vpack.c.bf16 %v571_v27, %v569_v26 }
  0xf1   : > { %778 = vmatpush.bf16.msra.mxu0 %v1122_v1  ;;  %v574_v34 = vpack.c.bf16 %v572_v31, %v570_v30  ;;  %v607_v35 = vld [vmem:[%s1763_s3] sm:$0x3] }
  0xf2   : > { %792 = vmatpush.bf16.msra.mxu1 %v1186_v2  ;;  %806 = vmatpush.bf16.msra.mxu2 %v1126_v3  ;;  %v609_v36 = vperm.slane %v607_v35, 0  ;;  %v610_v39 = vperm.slane %v607_v35, 1 }
  0xf3   : > { %820 = vmatpush.bf16.msra.mxu3 %v1190_v7 }
  0xf5   : > { %779 = vmatpush.bf16.msra.mxu0 %v1114_v13 }
  0xf6   : > { %793 = vmatpush.bf16.msra.mxu1 %v1178_v14  ;;  %807 = vmatpush.bf16.msra.mxu2 %v1118_v15 }
  0xf7   : > { %821 = vmatpush.bf16.msra.mxu3 %v1182_v19 }
  0xf9   : > { %780 = vmatpush.bf16.msra.mxu0 %v1106_v25 }
  0xfa   : > { %794 = vmatpush.bf16.msra.mxu1 %v1170_v28  ;;  %808 = vmatpush.bf16.msra.mxu2 %v1110_v29 }
  0xfb   : > { %822 = vmatpush.bf16.msra.mxu3 %v1174_v32 }
  0xfc   : > { %781 = vmatmul.bf16.vlgmr.msra.gmra.mxu0 %v573_v33 }
  0xfd   : > { %795 = vmatmul.bf16.vlgmr.msra.gmra.mxu1 %v574_v34  ;;  %809 = vmatmul.bf16.vlgmr.msra.gmra.mxu2 %v573_v33 }
  0xfe   : > { %823 = vmatmul.bf16.vlgmr.msra.gmra.mxu3 %v574_v34 }
 0x179   : > { %v782_v37 = vpop.f32.mrf.mxu0 }
 0x17a   : > { %v783_v38 = vadd.f32 %v782_v37, %v609_v36  ;;  %v796_v40 = vpop.f32.mrf.mxu1 }
 0x17c   : > { %v797_v41 = vadd.f32 %v796_v40, %v783_v38 }
 0x17e   : > { %v829_v47 = vmul.f32 %v797_v41, %v797_v41 }
 0x180   : > { %v810_v42 = vpop.f32.mrf.mxu2 }
 0x181   : > { %v811_v43 = vadd.f32 %v810_v42, %v610_v39  ;;  %v824_v44 = vpop.f32.mrf.mxu3  ;;  %v784_v45 = vpop.f32.mrf.mxu0 }
 0x182   : > { %v785_v48 = vadd.f32 %v784_v45, %v609_v36  ;;  %v798_v51 = vpop.f32.mrf.mxu1 }
 0x183   : > { %v825_v46 = vadd.f32 %v824_v44, %v811_v43 }
 0x184   : > { %v799_v53 = vadd.f32 %v798_v51, %v785_v48 }
 0x185   : > { %v830_v49 = vmul.f32 %v825_v46, %v825_v46 }
 0x186   : > { %v831_v57 = vmul.f32 %v799_v53, %v799_v53 }
 0x187   : > { %v833_v50 = vadd.f32 %v830_v49, %v829_v47 }
 0x188   : > { %v812_v52 = vpop.f32.mrf.mxu2 }
 0x189   : > { %v813_v54 = vadd.f32 %v812_v52, %v610_v39  ;;  %834 = vadd.xlane.f32.xlu0 %v833_v50  ;;  %v826_v55 = vpop.f32.mrf.mxu3 }
 0x18b   : > { %v827_v56 = vadd.f32 %v826_v55, %v813_v54 }
 0x18d   : > { %v832_v58 = vmul.f32 %v827_v56, %v827_v56 }
 0x18f   : > { %v836_v59 = vadd.f32 %v832_v58, %v831_v57 }
 0x191   : > { %837 = vadd.xlane.f32.xlu0 %v836_v59 }
 0x1fc   : > { %v835_v60 = vpop.xlane.xlu0 %834 }
 0x1fd   : > { %v839_v61 = vadd.f32 1e-12, %v835_v60 }
 0x1ff   : > { %1344 = vrsqrt.f32 %v839_v61  ;;  %vm847_vm1 = vweird.f32 %v839_v61 }
 0x204   : > { %v838_v62 = vpop.xlane.xlu0 %837 }
 0x205   : > { %v1345_v63 = vpop.eup %1344  ;;  %v840_v0 = vadd.f32 1e-12, %v838_v62 }
 0x206   : > { %v842_v1 = vmul.f32 %v1345_v63, %v839_v61  ;;  %vm848_vm0 = vweird.f32 %v1345_v63 }
 0x207   : > { %1346 = vrsqrt.f32 %v840_v0  ;;  %vm849_vm2 = vmor %vm847_vm1, %vm848_vm0  ;;  %vm857_vm4 = vweird.f32 %v840_v0 }
 0x208   : > { %v843_v2 = vmul.f32 %v1345_v63, %v842_v1 }
 0x20a   : > { %v844_v3 = vmul.f32 0.5, %v843_v2 }
 0x20c   : > { %v845_v4 = vsub.f32 1.5, %v844_v3 }
 0x20d   : > { %v1347_v5 = vpop.eup %1346 }
 0x20e   : > { %v846_v6 = vmul.f32 %v1345_v63, %v845_v4  ;;  %v852_v7 = vmul.f32 %v1347_v5, %v840_v0  ;;  %vm858_vm3 = vweird.f32 %v1347_v5 }
 0x20f   : > { %vm859_vm5 = vmor %vm857_vm4, %vm858_vm3 }
 0x210   : > { %v850_v8 = vsel %vm849_vm2, %v1345_v63, %v846_v6  ;;  %v853_v9 = vmul.f32 %v1347_v5, %v852_v7 }
 0x211   : > { %v861_v10 = vmul.f32 %v850_v8, %v797_v41  ;;  %v862_v11 = vmul.f32 %v850_v8, %v825_v46 }
 0x212   : > { %v854_v12 = vmul.f32 0.5, %v853_v9 }
 0x213   : > { %865 = vst [vmem:[%s1764_s4] sm:$0xff] %v861_v10 }
 0x214   : > { %866 = vst [vmem:[%s1764_s4 + $0x8] sm:$0xff] %v862_v11  ;;  %v855_v13 = vsub.f32 1.5, %v854_v12 }
 0x216   : > { %v856_v14 = vmul.f32 %v1347_v5, %v855_v13 }
 0x218   : > { %v860_v15 = vsel %vm859_vm5, %v1347_v5, %v856_v14 }
 0x219   : > { %v863_v16 = vmul.f32 %v860_v15, %v799_v53  ;;  %v864_v17 = vmul.f32 %v860_v15, %v827_v56 }
 0x21b   : > { %867 = vst [vmem:[%s1764_s4 + $0x10] sm:$0xff] %v863_v16 }
 0x21c   : > { %868 = vst [vmem:[%s1764_s4 + $0x18] sm:$0xff] %v864_v17 }
 0x21d PF: > { %s14_s19 = sadd.s32 1, %s1386_s19   ;;  %s1765_s15 = smov %s1374_s16 }
 0x21e   : > { %p11_p12 = scmp.ge.s32.totalorder %s14_s19, 5   ;;  %s1766_s16 = smov %s1449_s23 }
 0x21f   : > { %s1767_s17 = smov %s1382_s18  ;;  %s1768_s18 = smov %s1770_s20 }
 0x220   :  { %13 = sbr.rel (!%p11_p12) target bundleno = 3 (0x3), region = 120 }

</bundles_post_ra>
